<compile_context>
chip_gen: v5e
topology: v5e:2x2
jax: 0.10.0
libtpu: 0.0.40
codegen_flags: <defaults>
</compile_context>

<pallas_src>
import functools

import numpy as np

import jax
import jax.numpy as jnp
from jax.experimental import pallas as pl
from jax.experimental.pallas import tpu as pltpu


_OUT_LANES = 128


def _doppleganger_kernel(scores_ref, emb_ref, tcol_ref, trow_ref, out_ref, sim_acc,
                         *, alpha_lift, alpha_margin, beta, eps):
    """Fused DopplegangerLoss forward.

    Grid axis 0 walks chunks of the embedding feature dimension and accumulates
    the (B, B) Gram matrix; the last step does all pairwise-loss math plus the
    NLL term and writes the scalar result (broadcast to a lane-dense row).
    """
    k = pl.program_id(0)

    @pl.when(k == 0)
    def _init():
        sim_acc[...] = jnp.zeros_like(sim_acc)

    # ---- streamed Gram accumulation: sim += E_chunk @ E_chunk.T ----
    # Feed the MXU in the native input dtype; accumulate in f32.
    e = emb_ref[...]
    sim_acc[...] += jax.lax.dot_general(
        e, e, (((1,), (1,)), ((), ())),
        preferred_element_type=jnp.float32,
    )

    @pl.when(k == pl.num_programs(0) - 1)
    def _finalize():
        sim = sim_acc[...]                                    # (B, B) f32
        B = sim.shape[0]
        tcol = tcol_ref[...]                                  # (B, 1) int32
        trow = trow_ref[...]                                  # (1, B) int32

        row = jax.lax.broadcasted_iota(jnp.int32, (B, B), 0)
        col = jax.lax.broadcasted_iota(jnp.int32, (B, B), 1)
        eye = row == col
        same = tcol == trow                                   # diag is True
        diff = jnp.logical_not(same)

        # Pairwise distances from the Gram matrix:
        # dist^2[i,j] = ||x_i||^2 + ||x_j||^2 - 2 x_i.x_j
        diag = jnp.where(eye, sim, 0.0)
        mag_col = jnp.sum(diag, axis=1, keepdims=True)        # (B, 1)
        mag_row = jnp.sum(diag, axis=0, keepdims=True)        # (1, B)
        dist = jnp.sqrt(jnp.maximum(mag_col + mag_row - 2.0 * sim, 0.0))

        # ---------------- LiftedStructureLoss (alpha = 9) ----------------
        neg_exp = jnp.where(diff, jnp.exp(alpha_lift - dist), 0.0)
        neg_sum_i = jnp.sum(neg_exp, axis=1, keepdims=True)   # (B, 1) l_ni
        neg_sum_j = jnp.sum(neg_exp, axis=0, keepdims=True)   # (1, B) l_nj (symmetric)
        l_n = jnp.log(neg_sum_i + neg_sum_j)                  # (B, B)
        pos_pair = jnp.logical_and(same, row < col)           # i < j, same label
        pair_term = jnp.maximum(l_n + dist, 0.0) ** 2
        lifted_sum = jnp.sum(jnp.where(pos_pair, pair_term, 0.0))
        counter = jnp.sum(pos_pair.astype(jnp.float32))
        lifted = jnp.where(counter > 0.0, lifted_sum / (2.0 * counter), 0.0)

        # ------------- ModifiedMarginLoss (alpha=0.1, beta=0.5) -------------
        pos_viol = jnp.where(same, jnp.maximum(alpha_margin + beta - sim, 0.0), 0.0)
        neg_viol = jnp.where(diff, jnp.maximum(sim - beta + alpha_margin, 0.0), 0.0)
        pos_denom = jnp.sum(pos_viol, axis=1, keepdims=True) + eps
        neg_denom = jnp.sum(neg_viol, axis=1, keepdims=True) + eps
        pos_max = jnp.max(pos_viol, axis=1, keepdims=True)
        neg_max = jnp.max(neg_viol, axis=1, keepdims=True)
        # PyTorch adds the *first* masked-select element (batch order), gated on
        # the *max* normalized violation (sorted descending, index 0) > 0.5.
        big = jnp.int32(B)
        pos_first = jnp.min(jnp.where(same, col, big), axis=1, keepdims=True)
        neg_first = jnp.min(jnp.where(diff, col, big), axis=1, keepdims=True)
        pos_first_val = jnp.sum(jnp.where(col == pos_first, pos_viol, 0.0),
                                axis=1, keepdims=True)
        neg_first_val = jnp.sum(jnp.where(col == neg_first, neg_viol, 0.0),
                                axis=1, keepdims=True)
        has_neg = jnp.sum(diff.astype(jnp.float32), axis=1, keepdims=True) > 0.0
        add_pos = (pos_max / pos_denom) > 0.5
        add_neg = jnp.logical_and((neg_max / neg_denom) > 0.5, has_neg)
        margin = jnp.sum(jnp.where(add_pos, pos_first_val, 0.0)
                         + jnp.where(add_neg, neg_first_val, 0.0))

        # ---------------- NLLLoss (mean reduction) ----------------
        s = scores_ref[...].astype(jnp.float32)               # (B, C) log-probs
        n_cls = s.shape[1]
        ccol = jax.lax.broadcasted_iota(jnp.int32, (B, n_cls), 1)
        onehot = ccol == tcol
        std = -jnp.sum(jnp.where(onehot, s, 0.0)) / float(B)

        total = std + 0.1 * lifted + margin
        out_ref[...] = jnp.broadcast_to(total, out_ref.shape).astype(out_ref.dtype)


def _plan_feature_tiling(D):
    """Return (padded_D, tile_width).

    If D fits in a single block (<= 2048) we use one full-width block (legal
    regardless of alignment because block == full array).  Otherwise we stream
    lane-aligned tiles; if no clean divisor exists we zero-pad D up to a
    multiple of 512 (zero columns do not change the Gram matrix).
    """
    if D <= 2048:
        return D, D
    for cand in (2048, 1024, 512, 256, 128):
        if D % cand == 0:
            return D, cand
    tile = 512
    pad = (-D) % tile
    return D + pad, tile


def doppleganger_loss(scores, embeddings, targets,
                      *, alpha_lift=9.0, alpha_margin=0.1, beta=0.5):
    """Pallas TPU implementation of DopplegangerLoss.forward.

    scores:     (B, C) log-probabilities (input to nn.NLLLoss).
    embeddings: (B, D) float32 / bfloat16 embeddings.
    targets:    (B,)   integer class labels.
    Returns a float32 scalar.
    """
    scores = jnp.asarray(scores)
    embeddings = jnp.asarray(embeddings)
    targets = jnp.asarray(targets, jnp.int32).reshape(-1)     # target.squeeze()

    B, C = scores.shape
    B2, D = embeddings.shape
    assert B == B2 == targets.shape[0]

    tcol = targets.reshape(B, 1)
    trow = targets.reshape(1, B)

    D_pad, td = _plan_feature_tiling(D)
    if D_pad != D:
        embeddings = jnp.pad(embeddings, ((0, 0), (0, D_pad - D)))
    grid = (D_pad // td,)

    kernel = functools.partial(
        _doppleganger_kernel,
        alpha_lift=float(alpha_lift),
        alpha_margin=float(alpha_margin),
        beta=float(beta),
        eps=1e-5,
    )

    cost = pl.CostEstimate(
        flops=2 * B * B * D_pad + 64 * B * B,
        transcendentals=4 * B * B,
        bytes_accessed=int(B * D_pad * embeddings.dtype.itemsize
                           + scores.size * scores.dtype.itemsize
                           + 2 * B * 4 + _OUT_LANES * 4),
    )

    out = pl.pallas_call(
        kernel,
        out_shape=jax.ShapeDtypeStruct((1, _OUT_LANES), jnp.float32),
        grid_spec=pltpu.PrefetchScalarGridSpec(
            num_scalar_prefetch=0,
            grid=grid,
            in_specs=[
                pl.BlockSpec((B, C), lambda k: (0, 0)),    # scores (resident)
                pl.BlockSpec((B, td), lambda k: (0, k)),   # embeddings, streamed over D
                pl.BlockSpec((B, 1), lambda k: (0, 0)),    # targets as column
                pl.BlockSpec((1, B), lambda k: (0, 0)),    # targets as row
            ],
            out_specs=pl.BlockSpec((1, _OUT_LANES), lambda k: (0, 0)),
            scratch_shapes=[pltpu.VMEM((B, B), jnp.float32)],
        ),
        compiler_params=pltpu.CompilerParams(
            dimension_semantics=("arbitrary",),            # grid axis is a reduction
        ),
        cost_estimate=cost,
    )(scores, embeddings, tcol, trow)

    return out[0, 0]


def _reference_numpy(scores, embeddings, targets,
                     alpha_lift=9.0, alpha_margin=0.1, beta=0.5):
    """Literal numpy port of the PyTorch DopplegangerLoss forward."""
    s = np.asarray(scores, np.float64)
    e = np.asarray(embeddings, np.float64)
    t = np.asarray(targets)
    B = e.shape[0]

    # nn.NLLLoss (mean)
    std = -np.mean(s[np.arange(B), t])

    # LiftedStructureLoss
    mag = (e ** 2).sum(1)
    sim = e @ e.T
    dist = np.sqrt(np.maximum(mag[None, :] + mag[:, None] - 2.0 * sim, 0.0))
    loss_l, counter = 0.0, 0
    for i in range(B):
        for j in range(i + 1, B):
            if t[i] == t[j]:
                l_ni = np.exp(alpha_lift - dist[i][t != t[i]]).sum()
                l_nj = np.exp(alpha_lift - dist[j][t != t[j]]).sum()
                l_n = np.log(l_ni + l_nj)
                loss_l += max(l_n + dist[i, j], 0.0) ** 2
                counter += 1
    lifted = loss_l / (2 * counter) if counter else 0.0

    # ModifiedMarginLoss
    loss_m = 0.0
    for i in range(B):
        pos_v = np.maximum(alpha_margin + beta - sim[i][t == t[i]], 0.0)
        neg_v = np.maximum(sim[i][t != t[i]] - beta + alpha_margin, 0.0)
        if pos_v.max() / (pos_v.sum() + 1e-5) > 0.5:
            loss_m += pos_v[0]
        if neg_v.size and neg_v.max() / (neg_v.sum() + 1e-5) > 0.5:
            loss_m += neg_v[0]

    return std + 0.1 * lifted + loss_m


if __name__ == "__main__":
    key = jax.random.PRNGKey(0)
    k_logits, k_emb = jax.random.split(key)
    B, C, D = 8, 4, 32

    logits = jax.random.normal(k_logits, (B, C), dtype=jnp.float32)
    scores = jax.nn.log_softmax(logits, axis=-1)       # NLLLoss expects log-probs
    embeddings = jax.random.normal(k_emb, (B, D), dtype=jnp.float32)
    targets = jnp.array([0, 1, 0, 1, 0, 1, 0, 1], dtype=jnp.int32)

    loss = doppleganger_loss(scores, embeddings, targets)
    jax.block_until_ready(loss)

    ref = _reference_numpy(np.asarray(scores), np.asarray(embeddings),
                           np.asarray(targets))
    err = abs(float(loss) - float(ref))
    assert err <= 5e-3 * max(1.0, abs(float(ref))), (float(loss), float(ref), err)

    print("KERNEL_OK")
</pallas_src>

<mosaic_0001>
module attributes {stable_mosaic.version = 11 : i64} {
  func.func @_doppleganger_kernel(%arg0: i32, %arg1: memref<8x4xf32, #tpu.memory_space<vmem>>, %arg2: memref<8x32xf32, #tpu.memory_space<vmem>>, %arg3: memref<8x1xi32, #tpu.memory_space<vmem>>, %arg4: memref<1x8xi32, #tpu.memory_space<vmem>>, %arg5: memref<1x128xf32, #tpu.memory_space<vmem>>, %arg6: memref<8x8xf32, #tpu.memory_space<vmem>>) attributes {dimension_semantics = [#tpu.dimension_semantics<arbitrary>], iteration_bounds = array<i64: 1>, scalar_prefetch = 0 : i64, scratch_operands = 1 : i64, tpu.core_type = #tpu.core_type<tc>, window_params = [{pipeline_mode = #tpu.pipeline_mode<synchronous>, transform_indices = @transform_0, window_bounds = array<i64: 8, 4>}, {transform_indices = @transform_1, window_bounds = array<i64: 8, 32>}, {pipeline_mode = #tpu.pipeline_mode<synchronous>, transform_indices = @transform_2, window_bounds = array<i64: 8, 1>}, {pipeline_mode = #tpu.pipeline_mode<synchronous>, transform_indices = @transform_3, window_bounds = array<i64: 1, 8>}, {pipeline_mode = #tpu.pipeline_mode<synchronous>, transform_indices = @transform_4, window_bounds = array<i64: 1, 128>}]} {
    %c0_i32 = arith.constant 0 : i32
    %0 = arith.cmpi eq, %arg0, %c0_i32 : i32
    %1 = arith.extui %0 : i1 to i32
    %c0_i32_0 = arith.constant 0 : i32
    %2 = arith.cmpi ne, %1, %c0_i32_0 : i32
    scf.if %2 {
      %cst_8 = arith.constant 0.000000e+00 : f32
      %11 = vector.broadcast %cst_8 : f32 to vector<8x8xf32>
      %c0_9 = arith.constant 0 : index
      %c0_10 = arith.constant 0 : index
      %12 = vector.load %arg6[%c0_9, %c0_10] : memref<8x8xf32, #tpu.memory_space<vmem>>, vector<8x8xf32>
      tpu.vector_store %arg6[%c0_9, %c0_10], %11 {strides = array<i32>} : memref<8x8xf32, #tpu.memory_space<vmem>>, vector<8x8xf32>,
    } else {
    }
    %c0 = arith.constant 0 : index
    %c0_1 = arith.constant 0 : index
    %3 = vector.load %arg2[%c0, %c0_1] : memref<8x32xf32, #tpu.memory_space<vmem>>, vector<8x32xf32>
    %c0_2 = arith.constant 0 : index
    %c0_3 = arith.constant 0 : index
    %4 = vector.load %arg6[%c0_2, %c0_3] : memref<8x8xf32, #tpu.memory_space<vmem>>, vector<8x8xf32>
    %cst = arith.constant dense<0.000000e+00> : vector<8x8xf32>
    %5 = tpu.matmul %3, %3, %cst {dimension_numbers = #tpu.dot_dimension_numbers<[1], [1], [0], [0], [0, 0, 1, 0], [], []>} : vector<8x32xf32>, vector<8x32xf32>, vector<8x8xf32> -> vector<8x8xf32>
    %6 = arith.addf %4, %5 : vector<8x8xf32>
    %c0_4 = arith.constant 0 : index
    %c0_5 = arith.constant 0 : index
    %7 = vector.load %arg6[%c0_4, %c0_5] : memref<8x8xf32, #tpu.memory_space<vmem>>, vector<8x8xf32>
    tpu.vector_store %arg6[%c0_4, %c0_5], %6 {strides = array<i32>} : memref<8x8xf32, #tpu.memory_space<vmem>>, vector<8x8xf32>,
    %c0_i32_6 = arith.constant 0 : i32
    %8 = arith.cmpi eq, %arg0, %c0_i32_6 : i32
    %9 = arith.extui %8 : i1 to i32
    %c0_i32_7 = arith.constant 0 : i32
    %10 = arith.cmpi ne, %9, %c0_i32_7 : i32
    scf.if %10 {
      %c0_8 = arith.constant 0 : index
      %c0_9 = arith.constant 0 : index
      %11 = vector.load %arg6[%c0_8, %c0_9] : memref<8x8xf32, #tpu.memory_space<vmem>>, vector<8x8xf32>
      %c0_10 = arith.constant 0 : index
      %c0_11 = arith.constant 0 : index
      %12 = vector.load %arg3[%c0_10, %c0_11] : memref<8x1xi32, #tpu.memory_space<vmem>>, vector<8x1xi32>
      %c0_12 = arith.constant 0 : index
      %c0_13 = arith.constant 0 : index
      %13 = vector.load %arg4[%c0_12, %c0_13] : memref<1x8xi32, #tpu.memory_space<vmem>>, vector<1x8xi32>
      %14 = tpu.iota {dimensions = array<i32: 0>} : vector<8x8xi32>
      %15 = tpu.iota {dimensions = array<i32: 1>} : vector<8x8xi32>
      %16 = arith.cmpi eq, %14, %15 : vector<8x8xi32>
      %17 = vector.broadcast %12 : vector<8x1xi32> to vector<8x8xi32>
      %18 = vector.broadcast %13 : vector<1x8xi32> to vector<8x8xi32>
      %19 = arith.cmpi eq, %17, %18 : vector<8x8xi32>
      %cst_14 = arith.constant dense<true> : vector<8x8xi1>
      %20 = arith.xori %19, %cst_14 : vector<8x8xi1>
      %cst_15 = arith.constant 0.000000e+00 : f32
      %21 = vector.broadcast %cst_15 : f32 to vector<8x8xf32>
      %22 = arith.select %16, %11, %21 : vector<8x8xi1>, vector<8x8xf32>
      %cst_16 = arith.constant dense<0.000000e+00> : vector<8xf32>
      %23 = vector.multi_reduction <add>, %22, %cst_16 [1] : vector<8x8xf32> to vector<8xf32>
      %24 = vector.shape_cast %23 : vector<8xf32> to vector<8x1xf32>
      %cst_17 = arith.constant dense<0.000000e+00> : vector<8xf32>
      %25 = vector.multi_reduction <add>, %22, %cst_17 [0] : vector<8x8xf32> to vector<8xf32>
      %26 = vector.shape_cast %25 : vector<8xf32> to vector<1x8xf32>
      %27 = vector.broadcast %24 : vector<8x1xf32> to vector<8x8xf32>
      %28 = vector.broadcast %26 : vector<1x8xf32> to vector<8x8xf32>
      %29 = arith.addf %27, %28 : vector<8x8xf32>
      %cst_18 = arith.constant 2.000000e+00 : f32
      %30 = vector.broadcast %cst_18 : f32 to vector<8x8xf32>
      %31 = arith.mulf %30, %11 : vector<8x8xf32>
      %32 = arith.subf %29, %31 : vector<8x8xf32>
      %cst_19 = arith.constant 0.000000e+00 : f32
      %33 = vector.broadcast %cst_19 : f32 to vector<8x8xf32>
      %34 = arith.maximumf %32, %33 : vector<8x8xf32>
      %35 = math.sqrt %34 : vector<8x8xf32>
      %cst_20 = arith.constant 9.000000e+00 : f32
      %36 = vector.broadcast %cst_20 : f32 to vector<8x8xf32>
      %37 = arith.subf %36, %35 : vector<8x8xf32>
      %38 = math.exp %37 : vector<8x8xf32>
      %cst_21 = arith.constant 0.000000e+00 : f32
      %39 = vector.broadcast %cst_21 : f32 to vector<8x8xf32>
      %40 = arith.select %20, %38, %39 : vector<8x8xi1>, vector<8x8xf32>
      %cst_22 = arith.constant dense<0.000000e+00> : vector<8xf32>
      %41 = vector.multi_reduction <add>, %40, %cst_22 [1] : vector<8x8xf32> to vector<8xf32>
      %42 = vector.shape_cast %41 : vector<8xf32> to vector<8x1xf32>
      %cst_23 = arith.constant dense<0.000000e+00> : vector<8xf32>
      %43 = vector.multi_reduction <add>, %40, %cst_23 [0] : vector<8x8xf32> to vector<8xf32>
      %44 = vector.shape_cast %43 : vector<8xf32> to vector<1x8xf32>
      %45 = vector.broadcast %42 : vector<8x1xf32> to vector<8x8xf32>
      %46 = vector.broadcast %44 : vector<1x8xf32> to vector<8x8xf32>
      %47 = arith.addf %45, %46 : vector<8x8xf32>
      %48 = math.log %47 : vector<8x8xf32>
      %49 = arith.cmpi slt, %14, %15 : vector<8x8xi32>
      %50 = arith.andi %19, %49 : vector<8x8xi1>
      %51 = arith.addf %48, %35 : vector<8x8xf32>
      %cst_24 = arith.constant 0.000000e+00 : f32
      %52 = vector.broadcast %cst_24 : f32 to vector<8x8xf32>
      %53 = arith.maximumf %51, %52 : vector<8x8xf32>
      %54 = arith.mulf %53, %53 : vector<8x8xf32>
      %cst_25 = arith.constant 0.000000e+00 : f32
      %55 = vector.broadcast %cst_25 : f32 to vector<8x8xf32>
      %56 = arith.select %50, %54, %55 : vector<8x8xi1>, vector<8x8xf32>
      %57 = vector.shape_cast %56 : vector<8x8xf32> to vector<1x8x8xf32>
      %cst_26 = arith.constant dense<0.000000e+00> : vector<1xf32>
      %58 = vector.multi_reduction <add>, %57, %cst_26 [1, 2] : vector<1x8x8xf32> to vector<1xf32>
      %59 = vector.shape_cast %58 : vector<1xf32> to vector<1x1x1xf32>
      %60 = vector.extract %59[0, 0, 0] : f32 from vector<1x1x1xf32>
      %61 = arith.extui %50 : vector<8x8xi1> to vector<8x8xi32>
      %62 = arith.sitofp %61 : vector<8x8xi32> to vector<8x8xf32>
      %63 = vector.shape_cast %62 : vector<8x8xf32> to vector<1x8x8xf32>
      %cst_27 = arith.constant dense<0.000000e+00> : vector<1xf32>
      %64 = vector.multi_reduction <add>, %63, %cst_27 [1, 2] : vector<1x8x8xf32> to vector<1xf32>
      %65 = vector.shape_cast %64 : vector<1xf32> to vector<1x1x1xf32>
      %66 = vector.extract %65[0, 0, 0] : f32 from vector<1x1x1xf32>
      %cst_28 = arith.constant 0.000000e+00 : f32
      %67 = arith.cmpf ogt, %66, %cst_28 : f32
      %cst_29 = arith.constant 2.000000e+00 : f32
      %68 = arith.mulf %cst_29, %66 : f32
      %69 = arith.divf %60, %68 : f32
      %cst_30 = arith.constant 0.000000e+00 : f32
      %70 = arith.select %67, %69, %cst_30 : f32
      %cst_31 = arith.constant 6.000000e-01 : f32
      %71 = vector.broadcast %cst_31 : f32 to vector<8x8xf32>
      %72 = arith.subf %71, %11 : vector<8x8xf32>
      %cst_32 = arith.constant 0.000000e+00 : f32
      %73 = vector.broadcast %cst_32 : f32 to vector<8x8xf32>
      %74 = arith.maximumf %72, %73 : vector<8x8xf32>
      %cst_33 = arith.constant 0.000000e+00 : f32
      %75 = vector.broadcast %cst_33 : f32 to vector<8x8xf32>
      %76 = arith.select %19, %74, %75 : vector<8x8xi1>, vector<8x8xf32>
      %cst_34 = arith.constant 5.000000e-01 : f32
      %77 = vector.broadcast %cst_34 : f32 to vector<8x8xf32>
      %78 = arith.subf %11, %77 : vector<8x8xf32>
      %cst_35 = arith.constant 1.000000e-01 : f32
      %79 = vector.broadcast %cst_35 : f32 to vector<8x8xf32>
      %80 = arith.addf %78, %79 : vector<8x8xf32>
      %cst_36 = arith.constant 0.000000e+00 : f32
      %81 = vector.broadcast %cst_36 : f32 to vector<8x8xf32>
      %82 = arith.maximumf %80, %81 : vector<8x8xf32>
      %cst_37 = arith.constant 0.000000e+00 : f32
      %83 = vector.broadcast %cst_37 : f32 to vector<8x8xf32>
      %84 = arith.select %20, %82, %83 : vector<8x8xi1>, vector<8x8xf32>
      %cst_38 = arith.constant dense<0.000000e+00> : vector<8xf32>
      %85 = vector.multi_reduction <add>, %76, %cst_38 [1] : vector<8x8xf32> to vector<8xf32>
      %86 = vector.shape_cast %85 : vector<8xf32> to vector<8x1xf32>
      %cst_39 = arith.constant 9.99999974E-6 : f32
      %87 = vector.broadcast %cst_39 : f32 to vector<8x1xf32>
      %88 = arith.addf %86, %87 : vector<8x1xf32>
      %cst_40 = arith.constant dense<0.000000e+00> : vector<8xf32>
      %89 = vector.multi_reduction <add>, %84, %cst_40 [1] : vector<8x8xf32> to vector<8xf32>
      %90 = vector.shape_cast %89 : vector<8xf32> to vector<8x1xf32>
      %cst_41 = arith.constant 9.99999974E-6 : f32
      %91 = vector.broadcast %cst_41 : f32 to vector<8x1xf32>
      %92 = arith.addf %90, %91 : vector<8x1xf32>
      %cst_42 = arith.constant dense<0xFF800000> : vector<8xf32>
      %93 = vector.multi_reduction <maximumf>, %76, %cst_42 [1] : vector<8x8xf32> to vector<8xf32>
      %94 = vector.shape_cast %93 : vector<8xf32> to vector<8x1xf32>
      %cst_43 = arith.constant dense<0xFF800000> : vector<8xf32>
      %95 = vector.multi_reduction <maximumf>, %84, %cst_43 [1] : vector<8x8xf32> to vector<8xf32>
      %96 = vector.shape_cast %95 : vector<8xf32> to vector<8x1xf32>
      %c8_i32 = arith.constant 8 : i32
      %97 = vector.broadcast %c8_i32 : i32 to vector<8x8xi32>
      %98 = arith.select %19, %15, %97 : vector<8x8xi1>, vector<8x8xi32>
      %cst_44 = arith.constant dense<2147483647> : vector<8xi32>
      %99 = vector.multi_reduction <minsi>, %98, %cst_44 [1] : vector<8x8xi32> to vector<8xi32>
      %100 = vector.shape_cast %99 : vector<8xi32> to vector<8x1xi32>
      %c8_i32_45 = arith.constant 8 : i32
      %101 = vector.broadcast %c8_i32_45 : i32 to vector<8x8xi32>
      %102 = arith.select %20, %15, %101 : vector<8x8xi1>, vector<8x8xi32>
      %cst_46 = arith.constant dense<2147483647> : vector<8xi32>
      %103 = vector.multi_reduction <minsi>, %102, %cst_46 [1] : vector<8x8xi32> to vector<8xi32>
      %104 = vector.shape_cast %103 : vector<8xi32> to vector<8x1xi32>
      %105 = vector.broadcast %100 : vector<8x1xi32> to vector<8x8xi32>
      %106 = arith.cmpi eq, %15, %105 : vector<8x8xi32>
      %cst_47 = arith.constant 0.000000e+00 : f32
      %107 = vector.broadcast %cst_47 : f32 to vector<8x8xf32>
      %108 = arith.select %106, %76, %107 : vector<8x8xi1>, vector<8x8xf32>
      %cst_48 = arith.constant dense<0.000000e+00> : vector<8xf32>
      %109 = vector.multi_reduction <add>, %108, %cst_48 [1] : vector<8x8xf32> to vector<8xf32>
      %110 = vector.shape_cast %109 : vector<8xf32> to vector<8x1xf32>
      %111 = vector.broadcast %104 : vector<8x1xi32> to vector<8x8xi32>
      %112 = arith.cmpi eq, %15, %111 : vector<8x8xi32>
      %cst_49 = arith.constant 0.000000e+00 : f32
      %113 = vector.broadcast %cst_49 : f32 to vector<8x8xf32>
      %114 = arith.select %112, %84, %113 : vector<8x8xi1>, vector<8x8xf32>
      %cst_50 = arith.constant dense<0.000000e+00> : vector<8xf32>
      %115 = vector.multi_reduction <add>, %114, %cst_50 [1] : vector<8x8xf32> to vector<8xf32>
      %116 = vector.shape_cast %115 : vector<8xf32> to vector<8x1xf32>
      %117 = arith.extui %20 : vector<8x8xi1> to vector<8x8xi32>
      %118 = arith.sitofp %117 : vector<8x8xi32> to vector<8x8xf32>
      %cst_51 = arith.constant dense<0.000000e+00> : vector<8xf32>
      %119 = vector.multi_reduction <add>, %118, %cst_51 [1] : vector<8x8xf32> to vector<8xf32>
      %120 = vector.shape_cast %119 : vector<8xf32> to vector<8x1xf32>
      %cst_52 = arith.constant 0.000000e+00 : f32
      %121 = vector.broadcast %cst_52 : f32 to vector<8x1xf32>
      %122 = arith.cmpf ogt, %120, %121 : vector<8x1xf32>
      %123 = arith.divf %94, %88 : vector<8x1xf32>
      %cst_53 = arith.constant 5.000000e-01 : f32
      %124 = vector.broadcast %cst_53 : f32 to vector<8x1xf32>
      %125 = arith.cmpf ogt, %123, %124 : vector<8x1xf32>
      %126 = arith.divf %96, %92 : vector<8x1xf32>
      %cst_54 = arith.constant 5.000000e-01 : f32
      %127 = vector.broadcast %cst_54 : f32 to vector<8x1xf32>
      %128 = arith.cmpf ogt, %126, %127 : vector<8x1xf32>
      %129 = arith.andi %128, %122 : vector<8x1xi1>
      %cst_55 = arith.constant 0.000000e+00 : f32
      %130 = vector.broadcast %cst_55 : f32 to vector<8x1xf32>
      %131 = arith.select %125, %110, %130 : vector<8x1xi1>, vector<8x1xf32>
      %cst_56 = arith.constant 0.000000e+00 : f32
      %132 = vector.broadcast %cst_56 : f32 to vector<8x1xf32>
      %133 = arith.select %129, %116, %132 : vector<8x1xi1>, vector<8x1xf32>
      %134 = arith.addf %131, %133 : vector<8x1xf32>
      %135 = vector.shape_cast %134 : vector<8x1xf32> to vector<1x8x1xf32>
      %cst_57 = arith.constant dense<0.000000e+00> : vector<1xf32>
      %136 = vector.multi_reduction <add>, %135, %cst_57 [1, 2] : vector<1x8x1xf32> to vector<1xf32>
      %137 = vector.shape_cast %136 : vector<1xf32> to vector<1x1x1xf32>
      %138 = vector.extract %137[0, 0, 0] : f32 from vector<1x1x1xf32>
      %c0_58 = arith.constant 0 : index
      %c0_59 = arith.constant 0 : index
      %139 = vector.load %arg1[%c0_58, %c0_59] : memref<8x4xf32, #tpu.memory_space<vmem>>, vector<8x4xf32>
      %140 = tpu.iota {dimensions = array<i32: 1>} : vector<8x4xi32>
      %141 = vector.broadcast %12 : vector<8x1xi32> to vector<8x4xi32>
      %142 = arith.cmpi eq, %140, %141 : vector<8x4xi32>
      %cst_60 = arith.constant 0.000000e+00 : f32
      %143 = vector.broadcast %cst_60 : f32 to vector<8x4xf32>
      %144 = arith.select %142, %139, %143 : vector<8x4xi1>, vector<8x4xf32>
      %145 = vector.shape_cast %144 : vector<8x4xf32> to vector<1x8x4xf32>
      %cst_61 = arith.constant dense<0.000000e+00> : vector<1xf32>
      %146 = vector.multi_reduction <add>, %145, %cst_61 [1, 2] : vector<1x8x4xf32> to vector<1xf32>
      %147 = vector.shape_cast %146 : vector<1xf32> to vector<1x1x1xf32>
      %148 = vector.extract %147[0, 0, 0] : f32 from vector<1x1x1xf32>
      %cst_62 = arith.constant 0.000000e+00 : f32
      %149 = arith.subf %cst_62, %148 : f32
      %cst_63 = arith.constant 8.000000e+00 : f32
      %150 = arith.divf %149, %cst_63 : f32
      %cst_64 = arith.constant 1.000000e-01 : f32
      %151 = arith.mulf %cst_64, %70 : f32
      %152 = arith.addf %150, %151 : f32
      %153 = arith.addf %152, %138 : f32
      %154 = vector.broadcast %153 : f32 to vector<1x128xf32>
      %c0_65 = arith.constant 0 : index
      %c0_66 = arith.constant 0 : index
      %155 = vector.load %arg5[%c0_65, %c0_66] : memref<1x128xf32, #tpu.memory_space<vmem>>, vector<1x128xf32>
      tpu.vector_store %arg5[%c0_65, %c0_66], %154 {strides = array<i32>} : memref<1x128xf32, #tpu.memory_space<vmem>>, vector<1x128xf32>,
    } else {
    }
    return
  }
  func.func @transform_0(%arg0: i32) -> (i32, i32) {
    %c0_i32 = arith.constant 0 : i32
    %c0_i32_0 = arith.constant 0 : i32
    %c0_i32_1 = arith.constant 0 : i32
    return %c0_i32, %c0_i32_0 : i32, i32
  }
  func.func @transform_1(%arg0: i32) -> (i32, i32) {
    %c0_i32 = arith.constant 0 : i32
    %c0_i32_0 = arith.constant 0 : i32
    return %c0_i32, %arg0 : i32, i32
  }
  func.func @transform_2(%arg0: i32) -> (i32, i32) {
    %c0_i32 = arith.constant 0 : i32
    %c0_i32_0 = arith.constant 0 : i32
    %c0_i32_1 = arith.constant 0 : i32
    return %c0_i32, %c0_i32_0 : i32, i32
  }
  func.func @transform_3(%arg0: i32) -> (i32, i32) {
    %c0_i32 = arith.constant 0 : i32
    %c0_i32_0 = arith.constant 0 : i32
    %c0_i32_1 = arith.constant 0 : i32
    return %c0_i32, %c0_i32_0 : i32, i32
  }
  func.func @transform_4(%arg0: i32) -> (i32, i32) {
    %c0_i32 = arith.constant 0 : i32
    %c0_i32_0 = arith.constant 0 : i32
    %c0_i32_1 = arith.constant 0 : i32
    return %c0_i32, %c0_i32_0 : i32, i32
  }
}

</mosaic_0001>

<bundles_post_ra>
// kernel: tpu_custom_call.1
= control target key start
LH: loop header
LB: loop body
LE: loop exit
PB: predicated region body
PF: predicated region fallthrough
CT: control target
= control target key end

     0   :  { %vm26_vm0 = vcmask 261120   ;;  %vm22_vm1 = vcmask 64512   ;;  %v385_v1 = vmov 0.0   ;;  %s510_s0 = inlined_call_operand.vmem [shape: f32[8,4], index: 0, kind: input, shape index: {}]   ;;  %s511_s1 = inlined_call_operand.vmem [shape: f32[8,32], index: 1, kind: input, shape index: {}]   ;;  %s512_s2 = inlined_call_operand.vmem [shape: s32[8,1], index: 2, kind: input, shape index: {}]   ;;  %s513_s3 = inlined_call_operand.vmem [shape: s32[1,8], index: 3, kind: input, shape index: {}]   ;;  %s514_s4 = inlined_call_operand.hbm [shape: f32[1,128], index: 4, kind: output, shape index: {}]  }
   0x1   :  { %v24_v0 = vld [vmem:[%s511_s1] sm:$0xff]  ;;  %23 = vst.msk [vmem:[#allocation2] sm:$0xff] %vm22_vm1, %v385_v1 }
   0x2   :  { %321 = vmatpush.xpose.msk.msra.mxu0 %vm26_vm0, %v24_v0 }
   0x3   :  { %9 = vsyncpa [#allocation4], 0  ;;  %v386_v2 = vmov 0   ;;  %v59_v5 = vlaneseq  ;;  %v57_v12 = vld [vmem:[%s512_s2] sm:$0xff]  ;;  %vm387_vm4 = vmmov 1   ;;  %vm279_vm15 = vcmask 31744  }
   0x4   :  { %343 = vset.pattern.permute.xlu0 %v386_v2  ;;  %v344_v28 = vld [vmem:[%s513_s3] ss:$0 sm:$0xff]  ;;  %s312_s6 = sshll.u32 %s514_s4, 4  ;;  %s389_s8 = smov [#allocation3]   ;;  %s313_s6 = int_to_ptr.hbm [resolvable:$true] %s312_s6 }
   0x5   :  { %322 = vmatmul.msk.f32.vlgmr.msra.gmra.mxu0 %vm26_vm0, %v24_v0  ;;  %v421_v7 = vshrl.u32 %v59_v5, 7  ;;  %v423_v8 = vand.u32 127, %v59_v5  ;;  %s310_s9 = sshll.u32 %s389_s8, 4  ;;  %s311_s9 = int_to_ptr.vmem [resolvable:$true] %s310_s9 }
   0x7   :  { %vm63_vm2 = vcmp.eq.s32.totalorder %v421_v7, %v423_v8  ;;  %vm112_vm10 = vcmp.lt.s32.totalorder %v421_v7, %v423_v8 }
   0x8   :  { %v25_v3 = vld [vmem:[#allocation2] sm:$0xff] }
  0x82   :  { %v47_v4 = vpop.f32.mrf.mxu0 }
  0x83   :  { %v50_v6 = vadd.f32 %v47_v4, %v25_v3 }
  0x85   :  { %52 = vst.msk [vmem:[#allocation2] sm:$0xff] %vm22_vm1, %v50_v6 }
  0x8c   :  { %v56_v9 = vld [vmem:[#allocation2] sm:$0xff] }
  0x8d   :  { %v70_v10 = vsel %vm63_vm2, %v56_v9, 0.0  ;;  %v81_v20 = vmul.f32 2.0, %v56_v9  ;;  %v160_v26 = vsub.f32 0.6, %v56_v9  ;;  %v324_v27 = vadd.f32 -0.5, %v56_v9 }
  0x8e   :  { %v71_v11 = vsel %vm22_vm1, %v70_v10, 0.0 }
  0x8f   :  { %72 = vadd.xlane.f32.xlu0 %v71_v11  ;;  %v74_v13 = vrot.slane %v71_v11, 4  ;;  %v161_v32 = vmax.f32 %v160_v26, 0.0  ;;  %v164_v33 = vadd.f32 0.1, %v324_v27 }
  0x91   :  { %v75_v14 = vadd.f32 %v74_v13, %v71_v11  ;;  %v165_v42 = vmax.f32 %v164_v33, 0.0 }
  0x93   :  { %v76_v15 = vrot.slane %v75_v14, 2 }
  0x95   :  { %v77_v16 = vadd.f32 %v76_v15, %v75_v14 }
  0x97   :  { %v78_v17 = vrot.slane %v77_v16, 1 }
  0x99   :  { %v79_v18 = vadd.f32 %v78_v17, %v77_v16 }
  0xa3   :  { %65 = vperm.xlu0 %343, %v57_v12  }
 0x102   :  { %v73_v19 = vpop.xlane.xlu0 %72 }
 0x103   :  { %v80_v21 = vadd.f32 %v79_v18, %v73_v19 }
 0x105   :  { %v82_v22 = vsub.f32 %v80_v21, %v81_v20 }
 0x107   :  { %v83_v23 = vmax.f32 %v82_v22, 0.0 }
 0x109   :  { %345 = vrsqrt.f32 %v83_v23  ;;  %vm91_vm6 = vcmp.eq.f32.partialorder %v83_v23, inf  ;;  %v94_v45 = vand.u32 2147483648, %v83_v23  ;;  %vm93_vm7 = vcmp.eq.f32.partialorder %v83_v23, 0.0 }
 0x10f   :  { %v346_v24 = vpop.eup %345 }
 0x110   :  { %v85_v25 = vmul.f32 %v346_v24, %v83_v23 }
 0x112   :  { %v86_v29 = vmul.f32 %v346_v24, %v85_v25 }
 0x114   :  { %v87_v30 = vmul.f32 0.5, %v86_v29 }
 0x115   :  { %v434_v31 = vpop.permute.xlu0 %65 }
 0x116   :  { %vm68_vm3 = vcmp.eq.s32.totalorder %v434_v31, %v344_v28  ;;  %v88_v34 = vsub.f32 1.5, %v87_v30  ;;  %vm277_vm14 = vcmp.eq.s32.totalorder %v423_v8, %v434_v31 }
 0x117   :  { %vm439_vm5 = vmxor %vm68_vm3, %vm387_vm4  ;;  %v181_v36 = vsel %vm68_vm3, %v423_v8, 8  ;;  %v448_v37 = vsel %vm68_vm3, %v161_v32, 0.0 }
 0x118   :  { %v182_v38 = vsel %vm22_vm1, %v181_v36, 2147483647  ;;  %v89_v39 = vmul.f32 %v346_v24, %v88_v34  ;;  %v197_v41 = vsel %vm439_vm5, %v423_v8, 8  ;;  %v456_v46 = vsel %vm439_vm5, %v165_v42, 0.0  ;;  %vm466_vm11 = vmand %vm68_vm3, %vm112_vm10 }
 0x119   :  { %v184_v40 = vshra.s32 %v182_v38, 16  ;;  %v198_v47 = vsel %vm22_vm1, %v197_v41, 2147483647  ;;  %v183_v58 = vand.u32 65535, %v182_v38  ;;  %v323_v13 = vsel %vm466_vm11, 1.0, %v385_v1 }
 0x11a   :  { %v90_v43 = vmul.f32 %v89_v39, %v83_v23  ;;  %v200_v51 = vshra.s32 %v198_v47, 16  ;;  %v199_v0 = vand.u32 65535, %v198_v47  ;;  %v130_v14 = vsel %vm22_vm1, %v323_v13, 0.0 }
 0x11b   :  { %v186_v44 = vcvt.s32.f32 %v184_v40  ;;  %v185_v61 = vcvt.s32.f32 %v183_v58  ;;  %v167_v16 = vsel %vm22_vm1, %v448_v37, 0.0  ;;  %v175_v22 = vsel %vm22_vm1, %v448_v37, -inf }
 0x11c   :  { %v92_v48 = vsel %vm91_vm6, %v83_v23, %v90_v43  ;;  %v202_v53 = vcvt.s32.f32 %v200_v51  ;;  %v201_v4 = vcvt.s32.f32 %v199_v0  ;;  %v171_v23 = vsel %vm22_vm1, %v456_v46, 0.0 }
 0x11d   :  { %187 = vmin.xlane.f32.xlu1 %v186_v44  ;;  %v95_v49 = vsel %vm93_vm7, %v94_v45, %v92_v48  ;;  %v178_v24 = vsel %vm22_vm1, %v456_v46, -inf  ;;  %v325_v25 = vsel %vm439_vm5, 1.0, %v385_v1 }
 0x11e   :  { %v96_v50 = vsub.f32 9.0, %v95_v49  ;;  %v225_v26 = vsel %vm22_vm1, %v325_v25, 0.0 }
 0x120   :  { %v97_v52 = vmul.f32 1.442695, %v96_v50 }
 0x122   :  { %347 = vpow2.f32 %v97_v52 }
 0x125   :  { %203 = vmin.xlane.f32.xlu1 %v202_v53 }
 0x128   :  { %v348_v54 = vpop.eup %347 }
 0x129   :  { %v99_v55 = vsel %vm439_vm5, %v348_v54, 0.0 }
 0x12a   :  { %v100_v56 = vsel %vm22_vm1, %v99_v55, 0.0 }
 0x12b   :  { %101 = vadd.xlane.f32.xlu2 %v100_v56  ;;  %v103_v57 = vrot.slane %v100_v56, 4 }
 0x12d   :  { %v104_v59 = vadd.f32 %v103_v57, %v100_v56 }
 0x12f   :  { %v105_v62 = vrot.slane %v104_v59, 2 }
 0x131   :  { %v106_v2 = vadd.f32 %v105_v62, %v104_v59 }
 0x133   :  { %v107_v5 = vrot.slane %v106_v2, 1 }
 0x135   :  { %v108_v10 = vadd.f32 %v107_v5, %v106_v2 }
 0x190   :  { %v188_v60 = vpop.xlane.xlu1 %187 }
 0x191   :  { %vm189_vm8 = vcmp.eq.f32.partialorder %v186_v44, %v188_v60  ;;  %v194_v27 = vcvt.f32.s32 %v188_v60 }
 0x192   :  { %v190_v63 = vsel %vm189_vm8, %v185_v61, inf }
 0x193   :  { %191 = vmin.xlane.f32.xlu2 %v190_v63  ;;  %v195_v29 = vshll.u32 %v194_v27, 16 }
 0x198   :  { %v204_v3 = vpop.xlane.xlu1 %203 }
 0x199   :  { %vm205_vm9 = vcmp.eq.f32.partialorder %v202_v53, %v204_v3  ;;  %v210_v33 = vcvt.f32.s32 %v204_v3 }
 0x19a   :  { %v206_v6 = vsel %vm205_vm9, %v201_v4, inf }
 0x19b   :  { %207 = vmin.xlane.f32.xlu1 %v206_v6  ;;  %v211_v39 = vshll.u32 %v210_v33, 16 }
 0x19e   :  { %v102_v11 = vpop.xlane.xlu2 %101 }
 0x19f   :  { %v109_v12 = vadd.f32 %v108_v10, %v102_v11 }
 0x1a1   :  { %349 = vlog2.f32 %v109_v12 }
 0x1a3   :  { %131 = vadd.xlane.f32.xlu1 %v130_v14 }
 0x1a7   :  { %v350_v7 = vpop.eup %349 }
 0x1a8   :  { %v111_v15 = vmul.f32 0.6931472, %v350_v7 }
 0x1aa   :  { %v114_v17 = vadd.f32 %v111_v15, %v95_v49 }
 0x1ab   :  { %168 = vadd.xlane.f32.xlu1 %v167_v16 }
 0x1ac   :  { %v115_v18 = vmax.f32 %v114_v17, 0.0 }
 0x1ae   :  { %v116_v19 = vmul.f32 %v115_v18, %v115_v18 }
 0x1b0   :  { %v117_v20 = vsel %vm466_vm11, %v116_v19, 0.0 }
 0x1b1   :  { %v118_v21 = vsel %vm22_vm1, %v117_v20, 0.0 }
 0x1b2   :  { %119 = vadd.xlane.f32.xlu2 %v118_v21 }
 0x1b3   :  { %176 = vmax.xlane.f32.xlu1 %v175_v22 }
 0x1ba   :  { %172 = vadd.xlane.f32.xlu2 %v171_v23 }
 0x1c2   :  { %179 = vmax.xlane.f32.xlu2 %v178_v24 }
 0x1ca   :  { %226 = vadd.xlane.f32.xlu2 %v225_v26 }
 0x206   :  { %v192_v28 = vpop.xlane.xlu2 %191 }
 0x207   :  { %v193_v30 = vcvt.f32.s32 %v192_v28 }
 0x209   :  { %v196_v32 = vadd.s32 %v195_v29, %v193_v30 }
 0x20b   :  { %vm213_vm12 = vcmp.eq.s32.totalorder %v423_v8, %v196_v32 }
 0x20c   :  { %v214_v34 = vsel %vm213_vm12, %v448_v37, 0.0  ;;  %v276_v37 = vld [vmem:[%s510_s0] sm:$0xff] }
 0x20d   :  { %v215_v36 = vsel %vm22_vm1, %v214_v34, 0.0  ;;  %v278_v43 = vsel %vm277_vm14, %v276_v37, 0.0 }
 0x20e   :  { %v208_v38 = vpop.xlane.xlu1 %207  ;;  %216 = vadd.xlane.f32.xlu0 %v215_v36  ;;  %v280_v45 = vsel %vm279_vm15, %v278_v43, 0.0 }
 0x20f   :  { %v209_v35 = vcvt.f32.s32 %v208_v38 }
 0x211   :  { %v212_v1 = vadd.s32 %v211_v39, %v209_v35 }
 0x213   :  { %vm218_vm13 = vcmp.eq.s32.totalorder %v423_v8, %v212_v1 }
 0x214   :  { %v219_v40 = vsel %vm218_vm13, %v456_v46, 0.0 }
 0x215   :  { %v220_v41 = vsel %vm22_vm1, %v219_v40, 0.0 }
 0x216   :  { %221 = vadd.xlane.f32.xlu1 %v220_v41  ;;  %v132_v42 = vpop.xlane.xlu1 %131  ;;  %v388_v41 = vmov 8.0  }
 0x217   :  { %v133_v44 = vrot.slane %v132_v42, 4 }
 0x219   :  { %v134_v47 = vadd.f32 %v133_v44, %v132_v42 }
 0x21b   :  { %v135_v48 = vrot.slane %v134_v47, 2 }
 0x21d   :  { %v136_v51 = vadd.f32 %v135_v48, %v134_v47 }
 0x21e   :  { %281 = vadd.xlane.f32.xlu1 %v280_v45  ;;  %v169_v57 = vpop.xlane.xlu1 %168 }
 0x21f   :  { %v137_v54 = vrot.slane %v136_v51, 1  ;;  %v170_v59 = vadd.f32 1e-05, %v169_v57 }
 0x221   :  { %v138_v55 = vadd.f32 %v137_v54, %v136_v51  ;;  %v240_v22 = vand.u32 2147483648, %v170_v59  ;;  %vm234_vm8 = vweird.f32 %v170_v59  ;;  %v238_v24 = vand.u32 2147483647, %v170_v59 }
 0x223   :  { %v241_v28 = vor.u32 1.1754944e-38, %v240_v22  ;;  %vm239_vm11 = vcmp.eq.f32.partialorder %v238_v24, 8.507059e+37 }
 0x225   :  { %v120_v49 = vpop.xlane.xlu2 %119 }
 0x226   :  { %v121_v46 = vrot.slane %v120_v49, 4  ;;  %v177_v29 = vpop.xlane.xlu1 %176 }
 0x228   :  { %v122_v50 = vadd.f32 %v121_v46, %v120_v49 }
 0x22a   :  { %v123_v52 = vrot.slane %v122_v50, 2 }
 0x22c   :  { %v124_v53 = vadd.f32 %v123_v52, %v122_v50 }
 0x22d   :  { %v173_v56 = vpop.xlane.xlu2 %172 }
 0x22e   :  { %v125_v8 = vrot.slane %v124_v53, 1  ;;  %v174_v58 = vadd.f32 1e-05, %v173_v56 }
 0x230   :  { %v126_v31 = vadd.f32 %v125_v8, %v124_v53  ;;  %351 = vrcp.f32 %v174_v58  ;;  %v256_v18 = vand.u32 2147483648, %v174_v58  ;;  %vm250_vm5 = vweird.f32 %v174_v58 }
 0x231   :  { %353 = vrcp.f32 %v170_v59  ;;  %v254_v19 = vand.u32 2147483647, %v174_v58 }
 0x232   :  { %326 = vpush %v126_v31  ;;  %v257_v25 = vor.u32 1.1754944e-38, %v256_v18 }
 0x233   :  { %328 = vpush %v138_v55  ;;  %vm255_vm10 = vcmp.eq.f32.partialorder %v254_v19, 8.507059e+37 }
 0x235   :  { %v180_v21 = vpop.xlane.xlu2 %179 }
 0x236   :  { %v352_v61 = vpop.eup %351 }
 0x237   :  { %v354_v62 = vpop.eup %353  ;;  %v246_v63 = vmul.f32 %v352_v61, %v174_v58  ;;  %vm251_vm4 = vweird.f32 %v352_v61 }
 0x238   :  { %v230_v2 = vmul.f32 %v354_v62, %v170_v59  ;;  %vm235_vm6 = vweird.f32 %v354_v62  ;;  %vm252_vm7 = vmor %vm250_vm5, %vm251_vm4 }
 0x239   :  { %v247_v4 = vsub.f32 1.0, %v246_v63  ;;  %vm236_vm9 = vmor %vm234_vm8, %vm235_vm6 }
 0x23a   :  { %v231_v9 = vsub.f32 1.0, %v230_v2 }
 0x23b   :  { %v248_v12 = vmul.f32 %v352_v61, %v247_v4 }
 0x23c   :  { %v232_v7 = vmul.f32 %v354_v62, %v231_v9 }
 0x23d   :  { %v249_v16 = vadd.f32 %v352_v61, %v248_v12  ;;  %v227_v34 = vpop.xlane.xlu2 %226 }
 0x23e   :  { %v233_v20 = vadd.f32 %v354_v62, %v232_v7  ;;  %vm228_vm13 = vcmp.gt.f32.partialorder %v227_v34, 0.0 }
 0x23f   :  { %v253_v23 = vsel %vm252_vm7, %v352_v61, %v249_v16 }
 0x240   :  { %v237_v26 = vsel %vm236_vm9, %v354_v62, %v233_v20  ;;  %v258_v27 = vsel %vm255_vm10, %v257_v25, %v253_v23 }
 0x241   :  { %v242_v30 = vsel %vm239_vm11, %v241_v28, %v237_v26  ;;  %v259_v32 = vmul.f32 %v258_v27, %v180_v21 }
 0x242   :  { %v243_v33 = vmul.f32 %v242_v30, %v177_v29 }
 0x243   :  { %vm260_vm12 = vcmp.gt.f32.partialorder %v259_v32, 0.5 }
 0x244   :  { %vm244_vm14 = vcmp.gt.f32.partialorder %v243_v33, 0.5  ;;  %vm261_vm15 = vmand %vm260_vm12, %vm228_vm13 }
 0x263   :  { %s500_s0 = spop %326 }
 0x264   :  { %s502_s20 = spop %328 }
 0x265   :  { %s141_s21 = smul.f32 2.0, %s502_s20  ;;  %p140_p0 = scmp.gt.f32.partialorder %s502_s20, 0.0 }
 0x267   :  { %v142_v60 = vstv %s141_s21 }
 0x268   :  { %355 = vrcp.f32 %v142_v60  ;;  %v154_v6 = vand.u32 2147483648, %v142_v60  ;;  %v152_v11 = vand.u32 2147483647, %v142_v60  ;;  %vm148_vm1 = vweird.f32 %v142_v60 }
 0x269   :  { %357 = vrcp.f32 %v388_v41 }
 0x26a   :  { %v155_v14 = vor.u32 1.1754944e-38, %v154_v6  ;;  %vm153_vm3 = vcmp.eq.f32.partialorder %v152_v11, 8.507059e+37 }
 0x26e   :  { %v356_v0 = vpop.eup %355 }
 0x26f   :  { %v144_v3 = vmul.f32 %v356_v0, %v142_v60  ;;  %vm149_vm0 = vweird.f32 %v356_v0  ;;  %v358_v43 = vpop.eup %357 }
 0x270   :  { %vm150_vm2 = vmor %vm148_vm1, %vm149_vm0  ;;  %vm265_vm0 = vcmask 7168   ;;  %v292_v45 = vmul.f32 8.0, %v358_v43  ;;  %vm296_vm1 = vweird.f32 %v358_v43 }
 0x271   :  { %v145_v5 = vsub.f32 1.0, %v144_v3 }
 0x272   :  { %v293_v49 = vsub.f32 1.0, %v292_v45 }
 0x273   :  { %v146_v10 = vmul.f32 %v356_v0, %v145_v5 }
 0x274   :  { %v294_v52 = vmul.f32 %v358_v43, %v293_v49 }
 0x275   :  { %v147_v13 = vadd.f32 %v356_v0, %v146_v10 }
 0x276   :  { %v295_v31 = vadd.f32 %v358_v43, %v294_v52 }
 0x277   :  { %v151_v15 = vsel %vm150_vm2, %v356_v0, %v147_v13 }
 0x278   :  { %v156_v17 = vsel %vm153_vm3, %v155_v14, %v151_v15  ;;  %v297_v58 = vsel %vm296_vm1, %v358_v43, %v295_v31 }
 0x279   :  { %330 = vpush %v156_v17 }
 0x281   :  { %v217_v36 = vpop.xlane.xlu0 %216 }
 0x282   :  { %v262_v39 = vsel %vm244_vm14, %v217_v36, 0.0 }
 0x289   :  { %v222_v38 = vpop.xlane.xlu1 %221 }
 0x28a   :  { %v263_v35 = vsel %vm261_vm15, %v222_v38, 0.0 }
 0x28b   :  { %v264_v1 = vadd.f32 %v263_v35, %v262_v39 }
 0x28d   :  { %v266_v40 = vsel %vm265_vm0, %v264_v1, 0.0 }
 0x28e   :  { %267 = vadd.xlane.f32.xlu2 %v266_v40 }
 0x291   :  { %v282_v37 = vpop.xlane.xlu1 %281 }
 0x292   :  { %v283_v42 = vrot.slane %v282_v37, 4 }
 0x294   :  { %v284_v44 = vadd.f32 %v283_v42, %v282_v37 }
 0x296   :  { %v285_v47 = vrot.slane %v284_v44, 2 }
 0x298   :  { %v286_v51 = vadd.f32 %v285_v47, %v284_v44 }
 0x29a   :  { %v287_v8 = vrot.slane %v286_v51, 1 }
 0x29c   :  { %v288_v57 = vadd.f32 %v287_v8, %v286_v51 }
 0x2aa   :  { %s331_s22 = spop %330 }
 0x2ab   :  { %s158_s23 = smul.f32 %s331_s22, %s500_s0 }
 0x2ad   :  { %s520_s23 = smov (!%p140_p0, %s158_s23), 0.0 }
 0x2ae   :  { %s300_s28 = smul.f32 0.1, %s520_s23 }
 0x301   :  { %v268_v48 = vpop.xlane.xlu2 %267 }
 0x302   :  { %v269_v46 = vrot.slane %v268_v48, 4 }
 0x304   :  { %v270_v50 = vadd.f32 %v269_v46, %v268_v48 }
 0x306   :  { %v271_v53 = vrot.slane %v270_v50, 2 }
 0x308   :  { %v272_v54 = vadd.f32 %v271_v53, %v270_v50 }
 0x30a   :  { %v273_v55 = vrot.slane %v272_v54, 1 }
 0x30c   :  { %v274_v56 = vadd.f32 %v273_v55, %v272_v54 }
 0x30e   :  { %332 = vpush %v274_v56 }
 0x30f   :  { %334 = vpush %v288_v57 }
 0x310   :  { %336 = vpush %v297_v58 }
 0x33f   :  { %s333_s24 = spop %332 }
 0x340   :  { %s335_s25 = spop %334 }
 0x341   :  { %s290_s26 = ssub.f32 0.0, %s335_s25  ;;  %s337_s27 = spop %336 }
 0x343   :  { %s299_s29 = smul.f32 %s337_s27, %s290_s26 }
 0x345   :  { %s301_s7 = sadd.f32 %s300_s28, %s299_s29 }
 0x347   :  { %s302_s10 = sadd.f32 %s333_s24, %s301_s7 }
 0x349   :  { %v303_v59 = vstv %s302_s10 }
 0x34a   :  { %304 = vst [vmem:[#allocation3] sm:$0x1] %v303_v59 }
 0x34b   :  { %315 = dma.vmem_to_hbm [thread:$0]  %s311_s9, 16, %s313_s6, [#allocation4]  }
 0x34c   :  { %383 = dma.done.wait [#allocation4], 16  }
 0x34d   :  { %384 = vsyncadd [#allocation4], 4294967280 }
 0x34e   :  { %320 = vsyncpa [#allocation4], 1 }

</bundles_post_ra>
